<compile_context>
chip_gen: v7x
topology: tpu7x:2x2x1
jax: 0.10.0
libtpu: 0.0.40
codegen_flags: <defaults>
</compile_context>

<pallas_src>
import functools

import jax
import jax.numpy as jnp
from jax import lax
from jax.experimental import pallas as pl
from jax.experimental.pallas import tpu as pltpu


def _ls_ce_partial_kernel(x_ref, tgt_ref, out_ref, *, smoothing, n_rows):
    confidence = 1.0 - smoothing

    x = x_ref[...].astype(jnp.float32)              # (TM, C), cast in-kernel
    tm, c = x.shape

    # Fused per-row loss:
    #   loss = logsumexp(x) - confidence * x[tgt] - (smoothing / C) * sum(x)
    m = jnp.max(x, axis=-1, keepdims=True)                          # (TM, 1)
    sum_exp = jnp.sum(jnp.exp(x - m), axis=-1, keepdims=True)       # (TM, 1)
    lse = m + jnp.log(sum_exp)                                      # (TM, 1)

    sum_x = jnp.sum(x, axis=-1, keepdims=True)                      # (TM, 1)

    # Target gather folded into a single masked lane reduction over x.
    tgt = tgt_ref[...]                                              # (TM, 1)
    col = lax.broadcasted_iota(jnp.int32, (tm, c), 1)
    x_tgt = jnp.sum(jnp.where(col == tgt, x, 0.0), axis=-1, keepdims=True)

    row_loss = lse - confidence * x_tgt - (smoothing / c) * sum_x   # (TM, 1)

    # Mask rows beyond the true batch size (last tile may be padded; pad
    # contents are undefined, so use a select, not a multiply).
    row0 = pl.program_id(0) * tm
    row_idx = row0 + lax.broadcasted_iota(jnp.int32, (tm, 1), 0)
    valid = row_idx < n_rows
    partial = jnp.sum(jnp.where(valid, row_loss, 0.0))

    # Lane-dense per-tile partial-sum block (one unmasked vector store).
    out_ref[...] = jnp.full(out_ref.shape, partial, dtype=out_ref.dtype)


def _pick_block_rows(n, c):
    # Keep one (TM, C) f32-equivalent working tile around <= 6 MiB so the
    # double-buffered input + in-kernel f32 temporaries fit comfortably under
    # the 40 MiB scoped-VMEM limit on v5e / v6e / v7x.
    budget_f32_elems = (6 * 1024 * 1024) // 4
    tm = max(8, (budget_f32_elems // max(c, 1)) // 8 * 8)
    tm = min(tm, 512)
    if n <= tm:
        return n          # single block spanning the full batch (always legal)
    return tm             # multiple of 8, last tile padded + masked


def label_smoothing_cross_entropy(x, target, smoothing=0.1, *, block_rows=None):
    """x: (N, C) float logits (f32 or bf16), target: (N,) int class indices.

    Returns the scalar label-smoothed cross-entropy (float32), matching
    LabelSmoothingCrossEntropy.forward.
    """
    assert smoothing < 1.0
    n, c = x.shape
    target2d = target.reshape(n, 1).astype(jnp.int32)

    tm = _pick_block_rows(n, c) if block_rows is None else int(block_rows)
    num_tiles = pl.cdiv(n, tm)

    partials = pl.pallas_call(
        functools.partial(
            _ls_ce_partial_kernel, smoothing=float(smoothing), n_rows=n
        ),
        out_shape=jax.ShapeDtypeStruct((num_tiles, 8, 128), jnp.float32),
        grid=(num_tiles,),
        in_specs=[
            pl.BlockSpec((tm, c), lambda i: (i, 0)),
            pl.BlockSpec((tm, 1), lambda i: (i, 0)),
        ],
        out_specs=pl.BlockSpec((1, 8, 128), lambda i: (i, 0, 0)),
        compiler_params=pltpu.CompilerParams(
            dimension_semantics=("parallel",),
            vmem_limit_bytes=40 * 1024 * 1024,
        ),
    )(x, target2d)

    # Tiny final reduction of per-tile partials + mean over batch.
    return jnp.sum(partials[:, 0, 0]) / n


def _reference(x, target, smoothing=0.1):
    confidence = 1.0 - smoothing
    logprobs = jax.nn.log_softmax(x.astype(jnp.float32), axis=-1)
    nll = -jnp.take_along_axis(logprobs, target[:, None], axis=-1)[:, 0]
    smooth = -jnp.mean(logprobs, axis=-1)
    return jnp.mean(confidence * nll + smoothing * smooth)


if __name__ == "__main__":
    key = jax.random.PRNGKey(0)
    k1, k2, k3, k4, k5, k6 = jax.random.split(key, 6)

    # 1) Exact-fit single tile, f32 logits.
    n, c = 8, 32
    x = jax.random.normal(k1, (n, c), dtype=jnp.float32)
    t = jax.random.randint(k2, (n,), 0, c, dtype=jnp.int32)
    out = jax.block_until_ready(label_smoothing_cross_entropy(x, t, 0.1))
    ref = _reference(x, t, 0.1)
    assert jnp.allclose(out, ref, atol=1e-5, rtol=1e-5), (out, ref)

    # 2) Multi-tile grid with a padded (masked) tail tile.
    n, c = 20, 32
    x = jax.random.normal(k3, (n, c), dtype=jnp.float32)
    t = jax.random.randint(k4, (n,), 0, c, dtype=jnp.int32)
    out = jax.block_until_ready(
        label_smoothing_cross_entropy(x, t, 0.1, block_rows=8)
    )
    ref = _reference(x, t, 0.1)
    assert jnp.allclose(out, ref, atol=1e-5, rtol=1e-5), (out, ref)

    # 3) bf16 logits streamed as bf16 (f32 cast happens inside the kernel).
    n, c = 16, 128
    x = jax.random.normal(k5, (n, c), dtype=jnp.float32).astype(jnp.bfloat16)
    t = jax.random.randint(k6, (n,), 0, c, dtype=jnp.int32)
    out = jax.block_until_ready(label_smoothing_cross_entropy(x, t, 0.1))
    ref = _reference(x, t, 0.1)
    assert jnp.allclose(out, ref, atol=1e-4, rtol=1e-4), (out, ref)

    print("KERNEL_OK")
</pallas_src>

<mosaic_0001>
module attributes {stable_mosaic.version = 11 : i64} {
  func.func @_ls_ce_partial_kernel(%arg0: i32, %arg1: memref<8x32xf32, #tpu.memory_space<vmem>>, %arg2: memref<8x1xi32, #tpu.memory_space<vmem>>, %arg3: memref<1x8x128xf32, #tpu.memory_space<vmem>>) attributes {dimension_semantics = [#tpu.dimension_semantics<parallel>], iteration_bounds = array<i64: 1>, scalar_prefetch = 0 : i64, scratch_operands = 0 : i64, tpu.core_type = #tpu.core_type<tc>, window_params = [{transform_indices = @transform_0, window_bounds = array<i64: 8, 32>}, {transform_indices = @transform_1, window_bounds = array<i64: 8, 1>}, {transform_indices = @transform_2, window_bounds = array<i64: 1, 8, 128>}]} {
    %c0 = arith.constant 0 : index
    %c0_0 = arith.constant 0 : index
    %0 = vector.load %arg1[%c0, %c0_0] : memref<8x32xf32, #tpu.memory_space<vmem>>, vector<8x32xf32>
    %cst = arith.constant dense<0xFF800000> : vector<8xf32>
    %1 = vector.multi_reduction <maximumf>, %0, %cst [1] : vector<8x32xf32> to vector<8xf32>
    %2 = vector.shape_cast %1 : vector<8xf32> to vector<8x1xf32>
    %3 = vector.broadcast %2 : vector<8x1xf32> to vector<8x32xf32>
    %4 = arith.subf %0, %3 : vector<8x32xf32>
    %5 = math.exp %4 : vector<8x32xf32>
    %cst_1 = arith.constant dense<0.000000e+00> : vector<8xf32>
    %6 = vector.multi_reduction <add>, %5, %cst_1 [1] : vector<8x32xf32> to vector<8xf32>
    %7 = vector.shape_cast %6 : vector<8xf32> to vector<8x1xf32>
    %8 = math.log %7 : vector<8x1xf32>
    %9 = arith.addf %2, %8 : vector<8x1xf32>
    %cst_2 = arith.constant dense<0.000000e+00> : vector<8xf32>
    %10 = vector.multi_reduction <add>, %0, %cst_2 [1] : vector<8x32xf32> to vector<8xf32>
    %11 = vector.shape_cast %10 : vector<8xf32> to vector<8x1xf32>
    %c0_3 = arith.constant 0 : index
    %c0_4 = arith.constant 0 : index
    %12 = vector.load %arg2[%c0_3, %c0_4] : memref<8x1xi32, #tpu.memory_space<vmem>>, vector<8x1xi32>
    %13 = tpu.iota {dimensions = array<i32: 1>} : vector<8x32xi32>
    %14 = vector.broadcast %12 : vector<8x1xi32> to vector<8x32xi32>
    %15 = arith.cmpi eq, %13, %14 : vector<8x32xi32>
    %cst_5 = arith.constant 0.000000e+00 : f32
    %16 = vector.broadcast %cst_5 : f32 to vector<8x32xf32>
    %17 = arith.select %15, %0, %16 : vector<8x32xi1>, vector<8x32xf32>
    %cst_6 = arith.constant dense<0.000000e+00> : vector<8xf32>
    %18 = vector.multi_reduction <add>, %17, %cst_6 [1] : vector<8x32xf32> to vector<8xf32>
    %19 = vector.shape_cast %18 : vector<8xf32> to vector<8x1xf32>
    %cst_7 = arith.constant 0.899999976 : f32
    %20 = vector.broadcast %cst_7 : f32 to vector<8x1xf32>
    %21 = arith.mulf %20, %19 : vector<8x1xf32>
    %22 = arith.subf %9, %21 : vector<8x1xf32>
    %cst_8 = arith.constant 3.125000e-03 : f32
    %23 = vector.broadcast %cst_8 : f32 to vector<8x1xf32>
    %24 = arith.mulf %23, %11 : vector<8x1xf32>
    %25 = arith.subf %22, %24 : vector<8x1xf32>
    %c8_i32 = arith.constant 8 : i32
    %26 = arith.muli %arg0, %c8_i32 : i32
    %27 = tpu.iota {dimensions = array<i32: 0>} : vector<8x1xi32>
    %28 = vector.broadcast %26 : i32 to vector<8x1xi32>
    %29 = arith.addi %28, %27 : vector<8x1xi32>
    %c8_i32_9 = arith.constant 8 : i32
    %30 = vector.broadcast %c8_i32_9 : i32 to vector<8x1xi32>
    %31 = arith.cmpi slt, %29, %30 : vector<8x1xi32>
    %cst_10 = arith.constant 0.000000e+00 : f32
    %32 = vector.broadcast %cst_10 : f32 to vector<8x1xf32>
    %33 = arith.select %31, %25, %32 : vector<8x1xi1>, vector<8x1xf32>
    %34 = vector.shape_cast %33 : vector<8x1xf32> to vector<1x8x1xf32>
    %cst_11 = arith.constant dense<0.000000e+00> : vector<1xf32>
    %35 = vector.multi_reduction <add>, %34, %cst_11 [1, 2] : vector<1x8x1xf32> to vector<1xf32>
    %36 = vector.shape_cast %35 : vector<1xf32> to vector<1x1x1xf32>
    %37 = vector.extract %36[0, 0, 0] : f32 from vector<1x1x1xf32>
    %38 = vector.broadcast %37 : f32 to vector<1x8x128xf32>
    %c0_12 = arith.constant 0 : index
    %c0_13 = arith.constant 0 : index
    %c0_14 = arith.constant 0 : index
    %39 = vector.load %arg3[%c0_12, %c0_13, %c0_14] : memref<1x8x128xf32, #tpu.memory_space<vmem>>, vector<1x8x128xf32>
    tpu.vector_store %arg3[%c0_12, %c0_13, %c0_14], %38 {strides = array<i32>} : memref<1x8x128xf32, #tpu.memory_space<vmem>>, vector<1x8x128xf32>,
    return
  }
  func.func @transform_0(%arg0: i32) -> (i32, i32) {
    %c0_i32 = arith.constant 0 : i32
    %c0_i32_0 = arith.constant 0 : i32
    return %arg0, %c0_i32 : i32, i32
  }
  func.func @transform_1(%arg0: i32) -> (i32, i32) {
    %c0_i32 = arith.constant 0 : i32
    %c0_i32_0 = arith.constant 0 : i32
    return %arg0, %c0_i32 : i32, i32
  }
  func.func @transform_2(%arg0: i32) -> (i32, i32, i32) {
    %c0_i32 = arith.constant 0 : i32
    %c0_i32_0 = arith.constant 0 : i32
    %c0_i32_1 = arith.constant 0 : i32
    return %arg0, %c0_i32, %c0_i32_0 : i32, i32, i32
  }
}

</mosaic_0001>

<bundles_post_ra>
// kernel: tpu_custom_call.1
= control target key start
LH: loop header
LB: loop body
LE: loop exit
PB: predicated region body
PF: predicated region fallthrough
CT: control target
= control target key end

     0   :  { %vm13_vm0 = vcmask 261120   ;;  %s150_s0 = inlined_call_operand.vmem [shape: f32[8,32], index: 0, kind: input, shape index: {}]   ;;  %s151_s1 = inlined_call_operand.vmem [shape: s32[8,1], index: 1, kind: input, shape index: {}]   ;;  %s152_s2 = inlined_call_operand.hbm [shape: f32[1,8,128], index: 2, kind: output, shape index: {}]  }
   0x1   :  { %v12_v0 = vld [vmem:[%s150_s0] sm:$0xff] }
   0x2   :  { %7 = vsyncpa [#allocation3], 0  ;;  %v14_v1 = vsel %vm13_vm0, %v12_v0, -inf  ;;  %v111_v2 = vmov 0   ;;  %v29_v3 = vld [vmem:[%s151_s1] sm:$0xff]  ;;  %v30_v7 = vlaneseq  ;;  %v26_v14 = vsel %vm13_vm0, %v12_v0, 0.0 }
   0x3   :  { %82 = vset.pattern.permute.xlu0 %v111_v2  ;;  %vm51_vm2 = vcmask 7168   ;;  %s112_s0 = smov [#allocation2]  }
   0x4   :  { %15 = vmax.xlane.f32.xlu0 %v14_v1  ;;  %v31_v8 = vand.u32 127, %v30_v7  ;;  %s70_s1 = sshll.u32 %s112_s0, 4  ;;  %s71_s1 = int_to_ptr.vmem [resolvable:$true] %s70_s1 }
   0x5   :  { %s87_s14 = scalar_lea.vmem %s71_s1, 128  ;;  %p92_p1 = scmp.lt.s32.totalorder %s71_s1, %s71_s1 }
   0x6   :  { %p88_p0 = scmp.ne.s32.totalorder %s71_s1, %s87_s14  ;;  %p93_p2 = scmp.lt.s32.totalorder %s87_s14, %s87_s14 }
   0x8   :  { %p94_p3 = por %p93_p2, %p92_p1 }
   0xa   :  { %p95_p4 = pnand %p94_p3, %p88_p0 }
  0x1a   :  { %33 = vperm.xlu0 %82, %v29_v3  }
  0x91   :  { %v16_v4 = vpop.xlane.xlu0 %15 }
  0x92   :  { %v17_v5 = vsub.f32 %v12_v0, %v16_v4 }
  0x94   :  { %v18_v6 = vmul.f32 1.442695, %v17_v5 }
  0x96   :  { %83 = vpow2.f32 %v18_v6 }
  0x99   :  { %v34_v9 = vpop.permute.xlu0 %33 }
  0x9a   :  { %vm35_vm1 = vcmp.eq.s32.totalorder %v31_v8, %v34_v9 }
  0x9b   :  { %v36_v11 = vsel %vm35_vm1, %v12_v0, 0.0 }
  0x9c   :  { %v37_v13 = vsel %vm13_vm0, %v36_v11, 0.0 }
  0xa0   :  { %v84_v10 = vpop.eup %83 }
  0xa1   :  { %v20_v12 = vsel %vm13_vm0, %v84_v10, 0.0 }
  0xa2   :  { %21 = vadd.xlane.f32.xlu1 %v20_v12 }
  0xa6   :  { %38 = vadd.xlane.f32.xlu1 %v37_v13 }
  0xaa   :  { %27 = vadd.xlane.f32.xlu1 %v26_v14 }
 0x12f   :  { %v22_v15 = vpop.xlane.xlu1 %21 }
 0x130   :  { %85 = vlog2.f32 %v22_v15 }
 0x133   :  { %v39_v16 = vpop.xlane.xlu1 %38 }
 0x134   :  { %v40_v21 = vmul.f32 0.9, %v39_v16 }
 0x137   :  { %v28_v18 = vpop.xlane.xlu1 %27 }
 0x138   :  { %v42_v22 = vmul.f32 0.003125, %v28_v18 }
 0x13a   :  { %v86_v17 = vpop.eup %85 }
 0x13b   :  { %v24_v19 = vmul.f32 0.6931472, %v86_v17 }
 0x13d   :  { %v25_v20 = vadd.f32 %v24_v19, %v16_v4 }
 0x13f   :  { %v41_v23 = vsub.f32 %v25_v20, %v40_v21 }
 0x141   :  { %v43_v24 = vsub.f32 %v41_v23, %v42_v22 }
 0x143   :  { %v52_v25 = vsel %vm51_vm2, %v43_v24, 0.0 }
 0x144   :  { %53 = vadd.xlane.f32.xlu1 %v52_v25 }
 0x1d1   :  { %v54_v26 = vpop.xlane.xlu1 %53 }
 0x1d2   :  { %v55_v27 = vrot.slane %v54_v26, 4 }
 0x1d4   :  { %v56_v28 = vadd.f32 %v55_v27, %v54_v26 }
 0x1d6   :  { %v57_v29 = vrot.slane %v56_v28, 2 }
 0x1d8   :  { %v58_v30 = vadd.f32 %v57_v29, %v56_v28 }
 0x1da   :  { %v59_v31 = vrot.slane %v58_v30, 1 }
 0x1dc   :  { %v60_v32 = vadd.f32 %v59_v31, %v58_v30 }
 0x1de   :  { %78 = vpush %v60_v32 }
 0x20f   :  { %s79_s13 = spop %78 }
 0x210   :  { %v62_v33 = vstv %s79_s13 }
 0x211   :  { %63 = vst [vmem:[#allocation2] sm:$0xff] %v62_v33 }
 0x212   :  { %98 = shalt.err (!%p95_p4)
}
 0x213   :  { %s99_s17 = scalar_lea.hbm %s152_s2, 128 }
 0x214   :  { %p100_p5 = scmp.ne.s32.totalorder %s152_s2, %s99_s17  ;;  %p103_p6 = scmp.lt.u32.totalorder %s99_s17, %s152_s2 }
 0x216   :  { %p105_p7 = pnand %p103_p6, %p100_p5 }
 0x218   :  { %108 = shalt.err (!%p105_p7)
}
 0x219   :  { %73 = dma.vmem_to_hbm [thread:$0]  %s71_s1, 128, %s152_s2, [#allocation3]  }
 0x21a   :  { %109 = dma.done.wait [#allocation3], 128  }
 0x21b   :  { %110 = vsyncadd [#allocation3], 4294967168 }
 0x21c   :  { %77 = vsyncpa [#allocation3], 1 }

</bundles_post_ra>
